<compile_context>
chip_gen: v6e
topology: v6e:2x2x1
jax: 0.10.0
libtpu: 0.0.40
codegen_flags: <defaults>
</compile_context>

<pallas_src>
import functools

import jax
import jax.numpy as jnp
from jax import lax
from jax.experimental import pallas as pl
from jax.experimental.pallas import tpu as pltpu

NEG_BIG = -9e15


def _attend(wh, wh1, wh2_row, bias, alpha):
    """Masked-softmax attention aggregation, all values vreg-resident.

    wh:(N,F) projected features, wh1:(N,1) source scores, wh2_row:(1,N) dest
    scores, bias:(N,N) additive adjacency mask.  Returns att @ wh.
    """
    e = wh1 + wh2_row                                                      # (N,N)
    e = jnp.where(e > 0, e, alpha * e)                                     # LeakyReLU(alpha)
    logits = e + bias                                                      # masked via additive bias
    logits = logits - jnp.max(logits, axis=1, keepdims=True)               # softmax(dim=1)
    p = jnp.exp(logits)
    att = p / jnp.sum(p, axis=1, keepdims=True)                            # exact divide (parity)
    # TODO(synk): F.dropout on inputs / attention is identity here (inference mode).
    return jnp.dot(att, wh, preferred_element_type=jnp.float32)            # (N,F)


def _elu(v):
    # TODO(synk): expm1 would be bit-closer near 0-; exp-1 kept for proven lowering.
    return jnp.where(v > 0, v, jnp.exp(v) - 1.0)


def gat_fused_kernel(x_ref, w_all_ref, a_src_bd_ref, a_dst_bd_ref,
                     w_out_ref, ao_src_ref, ao_dst_ref, adj_ref,
                     o_ref, *, alpha, nheads, nhid):
    # Adjacency bias computed once, shared by all heads and the output layer.
    bias = jnp.where(adj_ref[...] > 0, 0.0, NEG_BIG)                       # (N,N)

    # One lane-dense MXU matmul for ALL heads: (N,Fin) @ (Fin, nheads*nhid).
    wh_all = jnp.dot(x_ref[...], w_all_ref[...],
                     preferred_element_type=jnp.float32)                   # (N, H*D)

    # Batched per-head score projections via block-diagonal matmuls.
    wh1_all = jnp.dot(wh_all, a_src_bd_ref[...],
                      preferred_element_type=jnp.float32)                  # (N, H)
    wh2_all = lax.dot_general(a_dst_bd_ref[...], wh_all,
                              (((1,), (1,)), ((), ())),
                              preferred_element_type=jnp.float32)          # (H, N)

    # Per-head attention (statically unrolled; all operands register-resident).
    head_outs = []
    for h in range(nheads):
        hp = _attend(wh_all[:, h * nhid:(h + 1) * nhid],
                     wh1_all[:, h:h + 1], wh2_all[h:h + 1, :], bias, alpha)
        head_outs.append(_elu(hp))                                         # ELU (concat=True)
    hcat = jnp.concatenate(head_outs, axis=1)                              # (N, H*D), in vregs

    # Output layer (concat=False: no ELU inside the layer), then F.elu + log_softmax.
    wh_out = jnp.dot(hcat, w_out_ref[...],
                     preferred_element_type=jnp.float32)                   # (N, nclass)
    wh1_o = jnp.sum(wh_out * ao_src_ref[...], axis=1, keepdims=True)       # (N,1)
    wh2_o = lax.dot_general(ao_dst_ref[...], wh_out, (((1,), (1,)), ((), ())),
                            preferred_element_type=jnp.float32)            # (1,N)
    y = _elu(_attend(wh_out, wh1_o, wh2_o, bias, alpha))                   # F.elu
    m = jnp.max(y, axis=1, keepdims=True)
    lse = m + jnp.log(jnp.sum(jnp.exp(y - m), axis=1, keepdims=True))
    o_ref[...] = y - lse                                                   # log_softmax(dim=1)


def _pack_params(params):
    """Pack per-head weights into lane-dense / block-diagonal slabs for the kernel."""
    heads = params["heads"]
    nhid = heads[0][0].shape[1]
    w_all = jnp.concatenate([w for w, _ in heads], axis=1)                 # (Fin, H*D)
    # Block-diagonal score projectors: (H*D, H) and (H, H*D).
    a_src_bd = jax.scipy.linalg.block_diag(*[a[:nhid, :1] for _, a in heads])
    a_dst_bd = jax.scipy.linalg.block_diag(*[a[nhid:, :1].T for _, a in heads])
    w_out, a_out = params["out"]
    nclass = w_out.shape[1]
    ao_src = a_out[:nclass, 0].reshape(1, nclass)
    ao_dst = a_out[nclass:, 0].reshape(1, nclass)
    return w_all, a_src_bd, a_dst_bd, w_out, ao_src, ao_dst, nhid, nclass


def gat_forward(x, adj, params, alpha):
    # x = F.dropout(x) -> identity (inference).
    (w_all, a_src_bd, a_dst_bd, w_out,
     ao_src, ao_dst, nhid, nclass) = _pack_params(params)
    nheads = len(params["heads"])
    n = x.shape[0]
    vmem = pl.BlockSpec(memory_space=pltpu.MemorySpace.VMEM)
    return pl.pallas_call(
        functools.partial(gat_fused_kernel, alpha=alpha, nheads=nheads, nhid=nhid),
        out_shape=jax.ShapeDtypeStruct((n, nclass), jnp.float32),
        in_specs=[vmem] * 8,
        out_specs=vmem,
    )(x, w_all, a_src_bd, a_dst_bd, w_out, ao_src, ao_dst, adj)


def gat_reference(x, adj, params, alpha):
    """Pure-JAX reference of the same forward (sanity check)."""
    def layer(h, w, a, concat):
        wh = h @ w
        fo = w.shape[1]
        wh1 = wh @ a[:fo]
        wh2 = wh @ a[fo:]
        e = wh1 + wh2.T
        e = jnp.where(e > 0, e, alpha * e)
        att = jnp.where(adj > 0, e, NEG_BIG)
        att = jax.nn.softmax(att, axis=1)
        hp = att @ wh
        return jax.nn.elu(hp) if concat else hp

    h = jnp.concatenate([layer(x, w, a, True) for w, a in params["heads"]], axis=1)
    y = jax.nn.elu(layer(h, *params["out"], False))
    return jax.nn.log_softmax(y, axis=1)


def init_params(key, nfeat, nhid, nclass, nheads):
    def xavier(k, shape, gain=1.414):
        fan_in, fan_out = shape[0], shape[1]
        bound = gain * (6.0 / (fan_in + fan_out)) ** 0.5
        return jax.random.uniform(k, shape, jnp.float32, -bound, bound)

    keys = jax.random.split(key, 2 * nheads + 2)
    heads = []
    for i in range(nheads):
        w = xavier(keys[2 * i], (nfeat, nhid))
        a = xavier(keys[2 * i + 1], (2 * nhid, 1))
        heads.append((w, a))
    w_out = xavier(keys[-2], (nhid * nheads, nclass))
    a_out = xavier(keys[-1], (2 * nclass, 1))
    return {"heads": heads, "out": (w_out, a_out)}


if __name__ == "__main__":
    # Small deterministic problem: N=16 nodes, nfeat=32, nhid=8, nclass=4, nheads=4.
    N, NFEAT, NHID, NCLASS, NHEADS = 16, 32, 8, 4, 4
    ALPHA = 0.2  # LeakyReLU negative slope

    key = jax.random.PRNGKey(0)
    kx, kadj, kp = jax.random.split(key, 3)

    x = jax.random.normal(kx, (N, NFEAT), jnp.float32)
    # Random symmetric adjacency with self loops, stored as float32 {0, 1}.
    a_rand = (jax.random.uniform(kadj, (N, N)) > 0.7).astype(jnp.float32)
    adj = jnp.clip(a_rand + a_rand.T + jnp.eye(N, dtype=jnp.float32), 0.0, 1.0)

    params = init_params(kp, NFEAT, NHID, NCLASS, NHEADS)

    out = gat_forward(x, adj, params, ALPHA)
    out = jax.block_until_ready(out)

    ref = gat_reference(x, adj, params, ALPHA)
    assert out.shape == (N, NCLASS)
    assert jnp.allclose(out, ref, rtol=2e-3, atol=2e-3), "mismatch vs JAX reference"

    print("KERNEL_OK")
</pallas_src>

<mosaic_0001>
module attributes {stable_mosaic.version = 11 : i64} {
  func.func @gat_fused_kernel(%arg0: memref<16x32xf32, #tpu.memory_space<vmem>>, %arg1: memref<32x32xf32, #tpu.memory_space<vmem>>, %arg2: memref<32x4xf32, #tpu.memory_space<vmem>>, %arg3: memref<4x32xf32, #tpu.memory_space<vmem>>, %arg4: memref<32x4xf32, #tpu.memory_space<vmem>>, %arg5: memref<1x4xf32, #tpu.memory_space<vmem>>, %arg6: memref<1x4xf32, #tpu.memory_space<vmem>>, %arg7: memref<16x16xf32, #tpu.memory_space<vmem>>, %arg8: memref<16x4xf32, #tpu.memory_space<vmem>>) attributes {dimension_semantics = [], scalar_prefetch = 0 : i64, scratch_operands = 0 : i64, tpu.core_type = #tpu.core_type<tc>} {
    %c0 = arith.constant 0 : index
    %c0_0 = arith.constant 0 : index
    %0 = vector.load %arg7[%c0, %c0_0] : memref<16x16xf32, #tpu.memory_space<vmem>>, vector<16x16xf32>
    %cst = arith.constant 0.000000e+00 : f32
    %1 = vector.broadcast %cst : f32 to vector<16x16xf32>
    %2 = arith.cmpf ogt, %0, %1 : vector<16x16xf32>
    %cst_1 = arith.constant 0.000000e+00 : f32
    %cst_2 = arith.constant -9.000000e+15 : f32
    %3 = vector.broadcast %cst_1 : f32 to vector<16x16xf32>
    %4 = vector.broadcast %cst_2 : f32 to vector<16x16xf32>
    %5 = arith.select %2, %3, %4 : vector<16x16xi1>, vector<16x16xf32>
    %c0_3 = arith.constant 0 : index
    %c0_4 = arith.constant 0 : index
    %6 = vector.load %arg0[%c0_3, %c0_4] : memref<16x32xf32, #tpu.memory_space<vmem>>, vector<16x32xf32>
    %c0_5 = arith.constant 0 : index
    %c0_6 = arith.constant 0 : index
    %7 = vector.load %arg1[%c0_5, %c0_6] : memref<32x32xf32, #tpu.memory_space<vmem>>, vector<32x32xf32>
    %cst_7 = arith.constant dense<0.000000e+00> : vector<16x32xf32>
    %8 = tpu.matmul %6, %7, %cst_7 {dimension_numbers = #tpu.dot_dimension_numbers<[1], [0], [0], [1], [0, 0, 1, 1], [], []>} : vector<16x32xf32>, vector<32x32xf32>, vector<16x32xf32> -> vector<16x32xf32>
    %c0_8 = arith.constant 0 : index
    %c0_9 = arith.constant 0 : index
    %9 = vector.load %arg2[%c0_8, %c0_9] : memref<32x4xf32, #tpu.memory_space<vmem>>, vector<32x4xf32>
    %cst_10 = arith.constant dense<0.000000e+00> : vector<16x4xf32>
    %10 = tpu.matmul %8, %9, %cst_10 {dimension_numbers = #tpu.dot_dimension_numbers<[1], [0], [0], [1], [0, 0, 1, 1], [], []>} : vector<16x32xf32>, vector<32x4xf32>, vector<16x4xf32> -> vector<16x4xf32>
    %c0_11 = arith.constant 0 : index
    %c0_12 = arith.constant 0 : index
    %11 = vector.load %arg3[%c0_11, %c0_12] : memref<4x32xf32, #tpu.memory_space<vmem>>, vector<4x32xf32>
    %cst_13 = arith.constant dense<0.000000e+00> : vector<4x16xf32>
    %12 = tpu.matmul %11, %8, %cst_13 {dimension_numbers = #tpu.dot_dimension_numbers<[1], [1], [0], [0], [0, 0, 1, 0], [], []>} : vector<4x32xf32>, vector<16x32xf32>, vector<4x16xf32> -> vector<4x16xf32>
    %13 = vector.extract_strided_slice %8 {offsets = [0, 0], sizes = [16, 8], strides = [1, 1]} : vector<16x32xf32> to vector<16x8xf32>
    %14 = vector.extract_strided_slice %10 {offsets = [0, 0], sizes = [16, 1], strides = [1, 1]} : vector<16x4xf32> to vector<16x1xf32>
    %15 = vector.extract_strided_slice %12 {offsets = [0, 0], sizes = [1, 16], strides = [1, 1]} : vector<4x16xf32> to vector<1x16xf32>
    %16 = vector.broadcast %14 : vector<16x1xf32> to vector<16x16xf32>
    %17 = vector.broadcast %15 : vector<1x16xf32> to vector<16x16xf32>
    %18 = arith.addf %16, %17 : vector<16x16xf32>
    %cst_14 = arith.constant 0.000000e+00 : f32
    %19 = vector.broadcast %cst_14 : f32 to vector<16x16xf32>
    %20 = arith.cmpf ogt, %18, %19 : vector<16x16xf32>
    %cst_15 = arith.constant 2.000000e-01 : f32
    %21 = vector.broadcast %cst_15 : f32 to vector<16x16xf32>
    %22 = arith.mulf %21, %18 : vector<16x16xf32>
    %23 = arith.select %20, %18, %22 : vector<16x16xi1>, vector<16x16xf32>
    %24 = arith.addf %23, %5 : vector<16x16xf32>
    %cst_16 = arith.constant dense<0xFF800000> : vector<16xf32>
    %25 = vector.multi_reduction <maximumf>, %24, %cst_16 [1] : vector<16x16xf32> to vector<16xf32>
    %26 = vector.shape_cast %25 : vector<16xf32> to vector<16x1xf32>
    %27 = vector.broadcast %26 : vector<16x1xf32> to vector<16x16xf32>
    %28 = arith.subf %24, %27 : vector<16x16xf32>
    %29 = math.exp %28 : vector<16x16xf32>
    %cst_17 = arith.constant dense<0.000000e+00> : vector<16xf32>
    %30 = vector.multi_reduction <add>, %29, %cst_17 [1] : vector<16x16xf32> to vector<16xf32>
    %31 = vector.shape_cast %30 : vector<16xf32> to vector<16x1xf32>
    %32 = vector.broadcast %31 : vector<16x1xf32> to vector<16x16xf32>
    %33 = arith.divf %29, %32 : vector<16x16xf32>
    %cst_18 = arith.constant dense<0.000000e+00> : vector<16x8xf32>
    %34 = tpu.matmul %33, %13, %cst_18 {dimension_numbers = #tpu.dot_dimension_numbers<[1], [0], [0], [1], [0, 0, 1, 1], [], []>} : vector<16x16xf32>, vector<16x8xf32>, vector<16x8xf32> -> vector<16x8xf32>
    %cst_19 = arith.constant 0.000000e+00 : f32
    %35 = vector.broadcast %cst_19 : f32 to vector<16x8xf32>
    %36 = arith.cmpf ogt, %34, %35 : vector<16x8xf32>
    %37 = math.exp %34 : vector<16x8xf32>
    %cst_20 = arith.constant 1.000000e+00 : f32
    %38 = vector.broadcast %cst_20 : f32 to vector<16x8xf32>
    %39 = arith.subf %37, %38 : vector<16x8xf32>
    %40 = arith.select %36, %34, %39 : vector<16x8xi1>, vector<16x8xf32>
    %41 = vector.extract_strided_slice %8 {offsets = [0, 8], sizes = [16, 8], strides = [1, 1]} : vector<16x32xf32> to vector<16x8xf32>
    %42 = vector.extract_strided_slice %10 {offsets = [0, 1], sizes = [16, 1], strides = [1, 1]} : vector<16x4xf32> to vector<16x1xf32>
    %43 = vector.extract_strided_slice %12 {offsets = [1, 0], sizes = [1, 16], strides = [1, 1]} : vector<4x16xf32> to vector<1x16xf32>
    %44 = vector.broadcast %42 : vector<16x1xf32> to vector<16x16xf32>
    %45 = vector.broadcast %43 : vector<1x16xf32> to vector<16x16xf32>
    %46 = arith.addf %44, %45 : vector<16x16xf32>
    %cst_21 = arith.constant 0.000000e+00 : f32
    %47 = vector.broadcast %cst_21 : f32 to vector<16x16xf32>
    %48 = arith.cmpf ogt, %46, %47 : vector<16x16xf32>
    %cst_22 = arith.constant 2.000000e-01 : f32
    %49 = vector.broadcast %cst_22 : f32 to vector<16x16xf32>
    %50 = arith.mulf %49, %46 : vector<16x16xf32>
    %51 = arith.select %48, %46, %50 : vector<16x16xi1>, vector<16x16xf32>
    %52 = arith.addf %51, %5 : vector<16x16xf32>
    %cst_23 = arith.constant dense<0xFF800000> : vector<16xf32>
    %53 = vector.multi_reduction <maximumf>, %52, %cst_23 [1] : vector<16x16xf32> to vector<16xf32>
    %54 = vector.shape_cast %53 : vector<16xf32> to vector<16x1xf32>
    %55 = vector.broadcast %54 : vector<16x1xf32> to vector<16x16xf32>
    %56 = arith.subf %52, %55 : vector<16x16xf32>
    %57 = math.exp %56 : vector<16x16xf32>
    %cst_24 = arith.constant dense<0.000000e+00> : vector<16xf32>
    %58 = vector.multi_reduction <add>, %57, %cst_24 [1] : vector<16x16xf32> to vector<16xf32>
    %59 = vector.shape_cast %58 : vector<16xf32> to vector<16x1xf32>
    %60 = vector.broadcast %59 : vector<16x1xf32> to vector<16x16xf32>
    %61 = arith.divf %57, %60 : vector<16x16xf32>
    %cst_25 = arith.constant dense<0.000000e+00> : vector<16x8xf32>
    %62 = tpu.matmul %61, %41, %cst_25 {dimension_numbers = #tpu.dot_dimension_numbers<[1], [0], [0], [1], [0, 0, 1, 1], [], []>} : vector<16x16xf32>, vector<16x8xf32>, vector<16x8xf32> -> vector<16x8xf32>
    %cst_26 = arith.constant 0.000000e+00 : f32
    %63 = vector.broadcast %cst_26 : f32 to vector<16x8xf32>
    %64 = arith.cmpf ogt, %62, %63 : vector<16x8xf32>
    %65 = math.exp %62 : vector<16x8xf32>
    %cst_27 = arith.constant 1.000000e+00 : f32
    %66 = vector.broadcast %cst_27 : f32 to vector<16x8xf32>
    %67 = arith.subf %65, %66 : vector<16x8xf32>
    %68 = arith.select %64, %62, %67 : vector<16x8xi1>, vector<16x8xf32>
    %69 = vector.extract_strided_slice %8 {offsets = [0, 16], sizes = [16, 8], strides = [1, 1]} : vector<16x32xf32> to vector<16x8xf32>
    %70 = vector.extract_strided_slice %10 {offsets = [0, 2], sizes = [16, 1], strides = [1, 1]} : vector<16x4xf32> to vector<16x1xf32>
    %71 = vector.extract_strided_slice %12 {offsets = [2, 0], sizes = [1, 16], strides = [1, 1]} : vector<4x16xf32> to vector<1x16xf32>
    %72 = vector.broadcast %70 : vector<16x1xf32> to vector<16x16xf32>
    %73 = vector.broadcast %71 : vector<1x16xf32> to vector<16x16xf32>
    %74 = arith.addf %72, %73 : vector<16x16xf32>
    %cst_28 = arith.constant 0.000000e+00 : f32
    %75 = vector.broadcast %cst_28 : f32 to vector<16x16xf32>
    %76 = arith.cmpf ogt, %74, %75 : vector<16x16xf32>
    %cst_29 = arith.constant 2.000000e-01 : f32
    %77 = vector.broadcast %cst_29 : f32 to vector<16x16xf32>
    %78 = arith.mulf %77, %74 : vector<16x16xf32>
    %79 = arith.select %76, %74, %78 : vector<16x16xi1>, vector<16x16xf32>
    %80 = arith.addf %79, %5 : vector<16x16xf32>
    %cst_30 = arith.constant dense<0xFF800000> : vector<16xf32>
    %81 = vector.multi_reduction <maximumf>, %80, %cst_30 [1] : vector<16x16xf32> to vector<16xf32>
    %82 = vector.shape_cast %81 : vector<16xf32> to vector<16x1xf32>
    %83 = vector.broadcast %82 : vector<16x1xf32> to vector<16x16xf32>
    %84 = arith.subf %80, %83 : vector<16x16xf32>
    %85 = math.exp %84 : vector<16x16xf32>
    %cst_31 = arith.constant dense<0.000000e+00> : vector<16xf32>
    %86 = vector.multi_reduction <add>, %85, %cst_31 [1] : vector<16x16xf32> to vector<16xf32>
    %87 = vector.shape_cast %86 : vector<16xf32> to vector<16x1xf32>
    %88 = vector.broadcast %87 : vector<16x1xf32> to vector<16x16xf32>
    %89 = arith.divf %85, %88 : vector<16x16xf32>
    %cst_32 = arith.constant dense<0.000000e+00> : vector<16x8xf32>
    %90 = tpu.matmul %89, %69, %cst_32 {dimension_numbers = #tpu.dot_dimension_numbers<[1], [0], [0], [1], [0, 0, 1, 1], [], []>} : vector<16x16xf32>, vector<16x8xf32>, vector<16x8xf32> -> vector<16x8xf32>
    %cst_33 = arith.constant 0.000000e+00 : f32
    %91 = vector.broadcast %cst_33 : f32 to vector<16x8xf32>
    %92 = arith.cmpf ogt, %90, %91 : vector<16x8xf32>
    %93 = math.exp %90 : vector<16x8xf32>
    %cst_34 = arith.constant 1.000000e+00 : f32
    %94 = vector.broadcast %cst_34 : f32 to vector<16x8xf32>
    %95 = arith.subf %93, %94 : vector<16x8xf32>
    %96 = arith.select %92, %90, %95 : vector<16x8xi1>, vector<16x8xf32>
    %97 = vector.extract_strided_slice %8 {offsets = [0, 24], sizes = [16, 8], strides = [1, 1]} : vector<16x32xf32> to vector<16x8xf32>
    %98 = vector.extract_strided_slice %10 {offsets = [0, 3], sizes = [16, 1], strides = [1, 1]} : vector<16x4xf32> to vector<16x1xf32>
    %99 = vector.extract_strided_slice %12 {offsets = [3, 0], sizes = [1, 16], strides = [1, 1]} : vector<4x16xf32> to vector<1x16xf32>
    %100 = vector.broadcast %98 : vector<16x1xf32> to vector<16x16xf32>
    %101 = vector.broadcast %99 : vector<1x16xf32> to vector<16x16xf32>
    %102 = arith.addf %100, %101 : vector<16x16xf32>
    %cst_35 = arith.constant 0.000000e+00 : f32
    %103 = vector.broadcast %cst_35 : f32 to vector<16x16xf32>
    %104 = arith.cmpf ogt, %102, %103 : vector<16x16xf32>
    %cst_36 = arith.constant 2.000000e-01 : f32
    %105 = vector.broadcast %cst_36 : f32 to vector<16x16xf32>
    %106 = arith.mulf %105, %102 : vector<16x16xf32>
    %107 = arith.select %104, %102, %106 : vector<16x16xi1>, vector<16x16xf32>
    %108 = arith.addf %107, %5 : vector<16x16xf32>
    %cst_37 = arith.constant dense<0xFF800000> : vector<16xf32>
    %109 = vector.multi_reduction <maximumf>, %108, %cst_37 [1] : vector<16x16xf32> to vector<16xf32>
    %110 = vector.shape_cast %109 : vector<16xf32> to vector<16x1xf32>
    %111 = vector.broadcast %110 : vector<16x1xf32> to vector<16x16xf32>
    %112 = arith.subf %108, %111 : vector<16x16xf32>
    %113 = math.exp %112 : vector<16x16xf32>
    %cst_38 = arith.constant dense<0.000000e+00> : vector<16xf32>
    %114 = vector.multi_reduction <add>, %113, %cst_38 [1] : vector<16x16xf32> to vector<16xf32>
    %115 = vector.shape_cast %114 : vector<16xf32> to vector<16x1xf32>
    %116 = vector.broadcast %115 : vector<16x1xf32> to vector<16x16xf32>
    %117 = arith.divf %113, %116 : vector<16x16xf32>
    %cst_39 = arith.constant dense<0.000000e+00> : vector<16x8xf32>
    %118 = tpu.matmul %117, %97, %cst_39 {dimension_numbers = #tpu.dot_dimension_numbers<[1], [0], [0], [1], [0, 0, 1, 1], [], []>} : vector<16x16xf32>, vector<16x8xf32>, vector<16x8xf32> -> vector<16x8xf32>
    %cst_40 = arith.constant 0.000000e+00 : f32
    %119 = vector.broadcast %cst_40 : f32 to vector<16x8xf32>
    %120 = arith.cmpf ogt, %118, %119 : vector<16x8xf32>
    %121 = math.exp %118 : vector<16x8xf32>
    %cst_41 = arith.constant 1.000000e+00 : f32
    %122 = vector.broadcast %cst_41 : f32 to vector<16x8xf32>
    %123 = arith.subf %121, %122 : vector<16x8xf32>
    %124 = arith.select %120, %118, %123 : vector<16x8xi1>, vector<16x8xf32>
    %125 = tpu.concatenate %40, %68, %96, %124 in 1 : vector<16x8xf32>, vector<16x8xf32>, vector<16x8xf32>, vector<16x8xf32> -> vector<16x32xf32>
    %c0_42 = arith.constant 0 : index
    %c0_43 = arith.constant 0 : index
    %126 = vector.load %arg4[%c0_42, %c0_43] : memref<32x4xf32, #tpu.memory_space<vmem>>, vector<32x4xf32>
    %cst_44 = arith.constant dense<0.000000e+00> : vector<16x4xf32>
    %127 = tpu.matmul %125, %126, %cst_44 {dimension_numbers = #tpu.dot_dimension_numbers<[1], [0], [0], [1], [0, 0, 1, 1], [], []>} : vector<16x32xf32>, vector<32x4xf32>, vector<16x4xf32> -> vector<16x4xf32>
    %c0_45 = arith.constant 0 : index
    %c0_46 = arith.constant 0 : index
    %128 = vector.load %arg5[%c0_45, %c0_46] : memref<1x4xf32, #tpu.memory_space<vmem>>, vector<1x4xf32>
    %129 = vector.broadcast %128 : vector<1x4xf32> to vector<16x4xf32>
    %130 = arith.mulf %127, %129 : vector<16x4xf32>
    %cst_47 = arith.constant dense<0.000000e+00> : vector<16xf32>
    %131 = vector.multi_reduction <add>, %130, %cst_47 [1] : vector<16x4xf32> to vector<16xf32>
    %132 = vector.shape_cast %131 : vector<16xf32> to vector<16x1xf32>
    %c0_48 = arith.constant 0 : index
    %c0_49 = arith.constant 0 : index
    %133 = vector.load %arg6[%c0_48, %c0_49] : memref<1x4xf32, #tpu.memory_space<vmem>>, vector<1x4xf32>
    %cst_50 = arith.constant dense<0.000000e+00> : vector<1x16xf32>
    %134 = tpu.matmul %133, %127, %cst_50 {dimension_numbers = #tpu.dot_dimension_numbers<[1], [1], [0], [0], [0, 0, 1, 0], [], []>} : vector<1x4xf32>, vector<16x4xf32>, vector<1x16xf32> -> vector<1x16xf32>
    %135 = vector.broadcast %132 : vector<16x1xf32> to vector<16x16xf32>
    %136 = vector.broadcast %134 : vector<1x16xf32> to vector<16x16xf32>
    %137 = arith.addf %135, %136 : vector<16x16xf32>
    %cst_51 = arith.constant 0.000000e+00 : f32
    %138 = vector.broadcast %cst_51 : f32 to vector<16x16xf32>
    %139 = arith.cmpf ogt, %137, %138 : vector<16x16xf32>
    %cst_52 = arith.constant 2.000000e-01 : f32
    %140 = vector.broadcast %cst_52 : f32 to vector<16x16xf32>
    %141 = arith.mulf %140, %137 : vector<16x16xf32>
    %142 = arith.select %139, %137, %141 : vector<16x16xi1>, vector<16x16xf32>
    %143 = arith.addf %142, %5 : vector<16x16xf32>
    %cst_53 = arith.constant dense<0xFF800000> : vector<16xf32>
    %144 = vector.multi_reduction <maximumf>, %143, %cst_53 [1] : vector<16x16xf32> to vector<16xf32>
    %145 = vector.shape_cast %144 : vector<16xf32> to vector<16x1xf32>
    %146 = vector.broadcast %145 : vector<16x1xf32> to vector<16x16xf32>
    %147 = arith.subf %143, %146 : vector<16x16xf32>
    %148 = math.exp %147 : vector<16x16xf32>
    %cst_54 = arith.constant dense<0.000000e+00> : vector<16xf32>
    %149 = vector.multi_reduction <add>, %148, %cst_54 [1] : vector<16x16xf32> to vector<16xf32>
    %150 = vector.shape_cast %149 : vector<16xf32> to vector<16x1xf32>
    %151 = vector.broadcast %150 : vector<16x1xf32> to vector<16x16xf32>
    %152 = arith.divf %148, %151 : vector<16x16xf32>
    %cst_55 = arith.constant dense<0.000000e+00> : vector<16x4xf32>
    %153 = tpu.matmul %152, %127, %cst_55 {dimension_numbers = #tpu.dot_dimension_numbers<[1], [0], [0], [1], [0, 0, 1, 1], [], []>} : vector<16x16xf32>, vector<16x4xf32>, vector<16x4xf32> -> vector<16x4xf32>
    %cst_56 = arith.constant 0.000000e+00 : f32
    %154 = vector.broadcast %cst_56 : f32 to vector<16x4xf32>
    %155 = arith.cmpf ogt, %153, %154 : vector<16x4xf32>
    %156 = math.exp %153 : vector<16x4xf32>
    %cst_57 = arith.constant 1.000000e+00 : f32
    %157 = vector.broadcast %cst_57 : f32 to vector<16x4xf32>
    %158 = arith.subf %156, %157 : vector<16x4xf32>
    %159 = arith.select %155, %153, %158 : vector<16x4xi1>, vector<16x4xf32>
    %cst_58 = arith.constant dense<0xFF800000> : vector<16xf32>
    %160 = vector.multi_reduction <maximumf>, %159, %cst_58 [1] : vector<16x4xf32> to vector<16xf32>
    %161 = vector.shape_cast %160 : vector<16xf32> to vector<16x1xf32>
    %162 = vector.broadcast %161 : vector<16x1xf32> to vector<16x4xf32>
    %163 = arith.subf %159, %162 : vector<16x4xf32>
    %164 = math.exp %163 : vector<16x4xf32>
    %cst_59 = arith.constant dense<0.000000e+00> : vector<16xf32>
    %165 = vector.multi_reduction <add>, %164, %cst_59 [1] : vector<16x4xf32> to vector<16xf32>
    %166 = vector.shape_cast %165 : vector<16xf32> to vector<16x1xf32>
    %167 = math.log %166 : vector<16x1xf32>
    %168 = arith.addf %161, %167 : vector<16x1xf32>
    %169 = vector.broadcast %168 : vector<16x1xf32> to vector<16x4xf32>
    %170 = arith.subf %159, %169 : vector<16x4xf32>
    %c0_60 = arith.constant 0 : index
    %c0_61 = arith.constant 0 : index
    %171 = vector.load %arg8[%c0_60, %c0_61] : memref<16x4xf32, #tpu.memory_space<vmem>>, vector<16x4xf32>
    tpu.vector_store %arg8[%c0_60, %c0_61], %170 {strides = array<i32>} : memref<16x4xf32, #tpu.memory_space<vmem>>, vector<16x4xf32>,
    return
  }
}

</mosaic_0001>

<bundles_post_ra>
// kernel: tpu_custom_call.1
= control target key start
LH: loop header
LB: loop body
LE: loop exit
PB: predicated region body
PF: predicated region fallthrough
CT: control target
= control target key end

     0   :  { %vm41_vm0 = vcmask 261120   ;;  %v1462_v10 = vmov 0.0   ;;  %vm1463_vm1 = vmmov 0   ;;  %v1464_v11 = vmov 1   ;;  %s1470_s27 = smov 112   ;;  %s1471_s28 = smov 104   ;;  %s1713_s1 = inlined_call_operand.vmem [shape: f32[32,32], index: 1, kind: input, shape index: {}]   ;;  %s1714_s0 = inlined_call_operand.vmem [shape: f32[16,32], index: 0, kind: input, shape index: {}]   ;;  %s1715_s2 = inlined_call_operand.vmem [shape: f32[32,4], index: 2, kind: input, shape index: {}]   ;;  %s1716_s3 = inlined_call_operand.vmem [shape: f32[4,32], index: 3, kind: input, shape index: {}]   ;;  %s1717_s7 = inlined_call_operand.vmem [shape: f32[16,16], index: 7, kind: input, shape index: {}]   ;;  %s1718_s4 = inlined_call_operand.vmem [shape: f32[32,4], index: 4, kind: input, shape index: {}]   ;;  %s1719_s5 = inlined_call_operand.vmem [shape: f32[1,4], index: 5, kind: input, shape index: {}]   ;;  %s1720_s6 = inlined_call_operand.vmem [shape: f32[1,4], index: 6, kind: input, shape index: {}]   ;;  %s1721_s8 = inlined_call_operand.vmem [shape: f32[16,4], index: 8, kind: output, shape index: {}]  }
   0x1   :  { %v40_v0 = vld [vmem:[%s1713_s1 + $0x18] sm:$0xff]  ;;  %v39_v1 = vld [vmem:[%s1713_s1 + $0x10] sm:$0xff]  ;;  %v35_v2 = vld [vmem:[%s1714_s0] sm:$0xff]  ;;  %1388 = vset.pattern.permute.xlu1 %v1464_v11  ;;  %v1465_v12 = vmov 0   ;;  %v1466_v19 = vmov 2   ;;  %v1467_v21 = vmov 3   ;;  %v292_v22 = vlaneseq }
   0x2   :  { %1292 = vmatprep.subr.mxu0 %v40_v0  ;;  %v38_v3 = vld [vmem:[%s1713_s1 + $0x8] sm:$0xff]  ;;  %1300 = vmatprep.mubr.msk.f32.mxu0 %vm41_vm0, %v35_v2  ;;  %v126_v4 = vld [vmem:[%s1715_s2 + $0x18] sm:$0xff]  ;;  %v125_v5 = vld [vmem:[%s1715_s2 + $0x10] sm:$0xff]  ;;  %v1468_v36 = vmov -9e+15   ;;  %vm306_vm6 = vcmask 130048  }
   0x3   :  { %1293 = vmatpush3.msra.mxu0 %v40_v0  ;;  %1303 = vmatprep.subr.mxu1 %v126_v4  ;;  %v37_v6 = vld [vmem:[%s1713_s1] sm:$0xff]  ;;  %v124_v7 = vld [vmem:[%s1715_s2 + $0x8] sm:$0xff]  ;;  %v1578_v23 = vshrl.u32 %v292_v22, 7  ;;  %s1472_s15 = smov 16   ;;  %s1474_s16 = smov 24  }
   0x4   :  { %1294 = vmatprep.subr.mxu0 %v39_v1  ;;  %1304 = vmatpush3.msra.mxu1 %v126_v4  ;;  %v36_v8 = vld [vmem:[%s1714_s0 + $0x8] sm:$0xff]  ;;  %v123_v9 = vld [vmem:[%s1715_s2] sm:$0xff] }
   0x5   :  { %1295 = vmatpush3.msra.mxu0 %v39_v1  ;;  %1305 = vmatprep.subr.mxu1 %v125_v5  ;;  %v208_v15 = vld [vmem:[%s1716_s3] sm:$0xf]  ;;  %v430_v24 = vsub.s32 1, %v1578_v23  ;;  %v294_v25 = vsub.s32 0, %v1578_v23  ;;  %v30_v26 = vld [vmem:[%s1717_s7 + $0x8] sm:$0xff]  ;;  %v571_v29 = vsub.s32 2, %v1578_v23 }
   0x6   :  { %1296 = vmatprep.subr.mxu0 %v38_v3  ;;  %1306 = vmatpush3.msra.mxu1 %v125_v5  ;;  %vm32_vm2 = vcmp.gt.f32.partialorder %v30_v26, 0.0  ;;  %v29_v34 = vld [vmem:[%s1717_s7] sm:$0xff]  ;;  %v712_v54 = vsub.s32 3, %v1578_v23  ;;  %s1469_s7 = smov 120  }
   0x7   :  { %1297 = vmatpush3.msra.mxu0 %v38_v3  ;;  %1307 = vmatprep.subr.mxu1 %v124_v7  ;;  %v1594_v37 = vsel %vm32_vm2, 0.0, %v1468_v36  ;;  %vm31_vm5 = vcmp.gt.f32.partialorder %v29_v34, 0.0 }
   0x8   :  { %1298 = vmatprep.subr.mxu0 %v37_v6  ;;  %1308 = vmatpush3.msra.mxu1 %v124_v7  ;;  %v1600_v49 = vsel %vm31_vm5, 0.0, %v1468_v36  ;;  %vm867_vm5 = vcmask 64512  }
   0x9   :  { %1299 = vmatpush3.msra.mxu0 %v37_v6  ;;  %1309 = vmatprep.subr.mxu1 %v123_v9 }
   0xa   :  { %1301 = vmatmul.mubr.msk.f32.vlgmr.msra.gmra.mxu0 %vm41_vm0, %v36_v8  ;;  %1310 = vmatpush3.msra.mxu1 %v123_v9 }
   0xb   :  { %1314 = vmatprep.subr.mxu0 %v1462_v10  ;;  %1318 = vmatprep.mubr.msk.f32.mxu0 %vm1463_vm1, %v1462_v10 }
   0xc   :  { %1387 = vset.pattern.permute.xlu0 %v1465_v12 }
  0xca   :  { %v1555_v13 = vpop.f32.mrf.mxu0 }
  0xcb   :  { %1315 = vmatpush3.xpose.msk.msra.mxu0 %vm41_vm0, %v1555_v13  ;;  %1321 = vmatprep.subr.mxu1 %v1555_v13 }
  0xcc   :  { %v1560_v14 = vpop.f32.mrf.mxu0  ;;  %1316 = vmatprep.subr.mxu0 %v1462_v10 }
  0xcd   :  { %1311 = vmatprep.mubr.msk.f32.mxu1 %vm41_vm0, %v1560_v14 }
  0xce   :  { %1312 = vmatmul.mubr.msk.f32.vlgmr.msra.gmra.mxu1 %vm41_vm0, %v1555_v13 }
  0xcf   :  { %1322 = vmatpush3.msra.mxu1 %v1555_v13  ;;  %1317 = vmatpush3.xpose.msk.msra.mxu0 %vm41_vm0, %v1560_v14 }
  0xd0   :  { %1323 = vmatprep.subr.mxu1 %v1560_v14 }
  0xd1   :  { %1324 = vmatpush3.msra.mxu1 %v1560_v14 }
  0xd2   :  { %1319 = vmatmul.mubr.msk.f32.vlgmr.msra.gmra.mxu0 %vm41_vm0, %v208_v15 }
 0x18e   :  { %v1313_v16 = vpop.f32.mrf.mxu1 }
 0x18f   :  { %425 = vperm.xlu1 %1388, %v1313_v16   ;;  %289 = vperm.xlu0 %1387, %v1313_v16  }
 0x190   :  { %v199_v17 = vpop.f32.mrf.mxu1 }
 0x192   :  { %v1576_v18 = vpop.f32.mrf.mxu0 }
 0x193   :  { %1389 = vset.pattern.permute.xlu1 %v1466_v19  ;;  %284 = vperm.xlu0 %1387, %v199_v17   ;;  %v431_v27 = vrot.slane %v1576_v18, %v430_v24  ;;  %v295_v28 = vrot.slane %v1576_v18, %v294_v25  ;;  %v572_v35 = vrot.slane %v1576_v18, %v571_v29 }
 0x194   :  { %566 = vperm.xlu1 %1389, %v1313_v16   ;;  %v1320_v20 = vpop.f32.mrf.mxu0  ;;  %v713_v1 = vrot.slane %v1576_v18, %v712_v54 }
 0x197   :  { %1391 = vset.pattern.permute.xlu0 %v1466_v19 }
 0x198   :  { %1390 = vset.pattern.permute.xlu1 %v1464_v11  ;;  %562 = vperm.xlu0 %1391, %v199_v17  }
 0x199   :  { %421 = vperm.xlu1 %1390, %v199_v17  }
 0x19c   :  { %1393 = vset.pattern.permute.xlu0 %v1467_v21 }
 0x19d   :  { %1392 = vset.pattern.permute.xlu1 %v1467_v21  ;;  %707 = vperm.xlu0 %1393, %v1313_v16  }
 0x19e   :  { %703 = vperm.xlu1 %1392, %v199_v17  }
 0x20a   :  { %v426_v30 = vpop.permute.xlu1 %425  ;;  %v290_v31 = vpop.permute.xlu0 %289 }
 0x20b   :  { %v433_v32 = vadd.f32 %v431_v27, %v426_v30  ;;  %v297_v33 = vadd.f32 %v295_v28, %v290_v31 }
 0x20d   :  { %vm435_vm3 = vcmp.gt.f32.partialorder %v433_v32, 0.0  ;;  %v437_v38 = vmul.f32 0.2, %v433_v32  ;;  %vm299_vm4 = vcmp.gt.f32.partialorder %v297_v33, 0.0  ;;  %v301_v39 = vmul.f32 0.2, %v297_v33 }
 0x20e   :  { %v285_v40 = vpop.permute.xlu0 %284 }
 0x20f   :  { %v296_v41 = vadd.f32 %v295_v28, %v285_v40  ;;  %v567_v42 = vpop.permute.xlu1 %566  ;;  %v303_v43 = vsel %vm299_vm4, %v297_v33, %v301_v39  ;;  %v439_v44 = vsel %vm435_vm3, %v433_v32, %v437_v38 }
 0x210   :  { %v574_v45 = vadd.f32 %v572_v35, %v567_v42  ;;  %v305_v46 = vadd.f32 %v303_v43, %v1594_v37  ;;  %v1598_v48 = vadd.f32 %v439_v44, %v1594_v37 }
 0x211   :  { %vm298_vm7 = vcmp.gt.f32.partialorder %v296_v41, 0.0  ;;  %v300_v47 = vmul.f32 0.2, %v296_v41 }
 0x212   :  { %vm576_vm8 = vcmp.gt.f32.partialorder %v574_v45, 0.0  ;;  %v578_v50 = vmul.f32 0.2, %v574_v45  ;;  %v310_v51 = vsel %vm306_vm6, %v305_v46, -inf  ;;  %v445_v60 = vsel %vm306_vm6, %v1598_v48, -inf }
 0x213   :  { %311 = vmax.xlane.f32.xlu0 %v310_v51  ;;  %v563_v52 = vpop.permute.xlu0 %562  ;;  %v302_v53 = vsel %vm298_vm7, %v296_v41, %v300_v47 }
 0x214   :  { %v573_v55 = vadd.f32 %v572_v35, %v563_v52  ;;  %v422_v56 = vpop.permute.xlu1 %421  ;;  %v304_v57 = vadd.f32 %v302_v53, %v1600_v49  ;;  %v580_v58 = vsel %vm576_vm8, %v574_v45, %v578_v50  ;;  %vm872_vm8 = vcmask 195584  }
 0x215   :  { %v432_v59 = vadd.f32 %v431_v27, %v422_v56  ;;  %v582_v63 = vadd.f32 %v580_v58, %v1594_v37 }
 0x216   :  { %vm575_vm9 = vcmp.gt.f32.partialorder %v573_v55, 0.0  ;;  %v577_v61 = vmul.f32 0.2, %v573_v55  ;;  %v307_v62 = vsel %vm306_vm6, %v304_v57, -inf }
 0x217   :  { %vm434_vm10 = vcmp.gt.f32.partialorder %v432_v59, 0.0  ;;  %v436_v0 = vmul.f32 0.2, %v432_v59  ;;  %446 = vmax.xlane.f32.xlu0 %v445_v60  ;;  %308 = vmax.xlane.f32.xlu1 %v307_v62  ;;  %v586_v8 = vsel %vm306_vm6, %v582_v63, -inf }
 0x218   :  { %v708_v2 = vpop.permute.xlu0 %707  ;;  %v579_v6 = vsel %vm575_vm9, %v573_v55, %v577_v61  ;;  %vm969_vm9 = vcmask 31744  }
 0x219   :  { %v715_v3 = vadd.f32 %v713_v1, %v708_v2  ;;  %v704_v4 = vpop.permute.xlu1 %703  ;;  %v438_v5 = vsel %vm434_vm10, %v432_v59, %v436_v0  ;;  %v581_v16 = vadd.f32 %v579_v6, %v1600_v49 }
 0x21a   :  { %v714_v7 = vadd.f32 %v713_v1, %v704_v4  ;;  %v440_v9 = vadd.f32 %v438_v5, %v1600_v49 }
 0x21b   :  { %vm717_vm11 = vcmp.gt.f32.partialorder %v715_v3, 0.0  ;;  %v719_v11 = vmul.f32 0.2, %v715_v3  ;;  %587 = vmax.xlane.f32.xlu0 %v586_v8  ;;  %v583_v20 = vsel %vm306_vm6, %v581_v16, -inf }
 0x21c   :  { %vm716_vm12 = vcmp.gt.f32.partialorder %v714_v7, 0.0  ;;  %v718_v12 = vmul.f32 0.2, %v714_v7  ;;  %v442_v15 = vsel %vm306_vm6, %v440_v9, -inf }
 0x21d   :  { %443 = vmax.xlane.f32.xlu1 %v442_v15  ;;  %v721_v17 = vsel %vm717_vm11, %v715_v3, %v719_v11 }
 0x21e   :  { %v723_v18 = vadd.f32 %v721_v17, %v1594_v37  ;;  %v720_v19 = vsel %vm716_vm12, %v714_v7, %v718_v12 }
 0x21f   :  { %v722_v22 = vadd.f32 %v720_v19, %v1600_v49 }
 0x220   :  { %v727_v21 = vsel %vm306_vm6, %v723_v18, -inf }
 0x221   :  { %584 = vmax.xlane.f32.xlu1 %v583_v20  ;;  %728 = vmax.xlane.f32.xlu0 %v727_v21  ;;  %v724_v24 = vsel %vm306_vm6, %v722_v22, -inf }
 0x225   :  { %725 = vmax.xlane.f32.xlu1 %v724_v24 }
 0x236   :  { %466 = vrot.lane.b32.xlu1 %v1555_v13, %s1469_s7 }
 0x237   :  { %464 = vrot.lane.b32.xlu0 %v1560_v14, %s1469_s7 }
 0x23a   :  { %607 = vrot.lane.b32.xlu1 %v1555_v13, %s1470_s27 }
 0x23e   :  { %748 = vrot.lane.b32.xlu1 %v1555_v13, %s1471_s28 }
 0x29c   :  { %v312_v26 = vpop.xlane.xlu0 %311 }
 0x29d   :  { %v314_v27 = vsub.f32 %v305_v46, %v312_v26 }
 0x29f   :  { %v317_v28 = vmul.f32 1.442695, %v314_v27 }
 0x2a0   :  { %v309_v29 = vpop.xlane.xlu1 %308  ;;  %v447_v30 = vpop.xlane.xlu0 %446 }
 0x2a1   :  { %1394 = vpow2.f32 %v317_v28  ;;  %v313_v31 = vsub.f32 %v304_v57, %v309_v29  ;;  %v449_v32 = vsub.f32 %v1598_v48, %v447_v30 }
 0x2a3   :  { %v315_v33 = vmul.f32 1.442695, %v313_v31  ;;  %v452_v34 = vmul.f32 1.442695, %v449_v32 }
 0x2a4   :  { %v588_v35 = vpop.xlane.xlu0 %587 }
 0x2a5   :  { %1396 = vpow2.f32 %v315_v33  ;;  %v590_v36 = vsub.f32 %v582_v63, %v588_v35 }
 0x2a6   :  { %1398 = vpow2.f32 %v452_v34  ;;  %v444_v38 = vpop.xlane.xlu1 %443 }
 0x2a7   :  { %v593_v39 = vmul.f32 1.442695, %v590_v36  ;;  %v448_v40 = vsub.f32 %v440_v9, %v444_v38 }
 0x2a9   :  { %1400 = vpow2.f32 %v593_v39  ;;  %v450_v13 = vmul.f32 1.442695, %v448_v40 }
 0x2aa   :  { %v585_v41 = vpop.xlane.xlu1 %584  ;;  %v729_v42 = vpop.xlane.xlu0 %728 }
 0x2ab   :  { %1402 = vpow2.f32 %v450_v13  ;;  %v589_v43 = vsub.f32 %v581_v16, %v585_v41  ;;  %v731_v44 = vsub.f32 %v723_v18, %v729_v42 }
 0x2ad   :  { %v591_v45 = vmul.f32 1.442695, %v589_v43  ;;  %v734_v46 = vmul.f32 1.442695, %v731_v44 }
 0x2ae   :  { %v1395_v47 = vpop.eup %1394  ;;  %v726_v48 = vpop.xlane.xlu1 %725 }
 0x2af   :  { %1404 = vpow2.f32 %v591_v45  ;;  %v730_v50 = vsub.f32 %v722_v22, %v726_v48  ;;  %v322_v51 = vsel %vm306_vm6, %v1395_v47, 0.0  ;;  %v465_v5 = vpop.permute.xlu0 %464 }
 0x2b0   :  { %1406 = vpow2.f32 %v734_v46  ;;  %323 = vadd.xlane.f32.xlu0 %v322_v51 }
 0x2b1   :  { %v732_v52 = vmul.f32 1.442695, %v730_v50 }
 0x2b2   :  { %v1397_v53 = vpop.eup %1396  ;;  %v467_v54 = vpop.permute.xlu1 %466 }
 0x2b3   :  { %v1399_v55 = vpop.eup %1398  ;;  %1408 = vpow2.f32 %v732_v52  ;;  %1328 = vmatprep.subr.mxu1 %v467_v54  ;;  %v319_v56 = vsel %vm306_vm6, %v1397_v53, 0.0  ;;  %v878_v52 = vld [vmem:[%s1718_s4 + $0x18] sm:$0xff] }
 0x2b4   :  { %320 = vadd.xlane.f32.xlu1 %v319_v56  ;;  %v457_v57 = vsel %vm306_vm6, %v1399_v55, 0.0 }
 0x2b5   :  { %458 = vadd.xlane.f32.xlu0 %v457_v57 }
 0x2b6   :  { %v1629_v58 = vpop.eup %1400  ;;  %v608_v59 = vpop.permute.xlu1 %607 }
 0x2b7   :  { %1335 = vmatprep.subr.mxu0 %v608_v59  ;;  %v598_v60 = vsel %vm306_vm6, %v1629_v58, 0.0 }
 0x2b8   :  { %v1403_v61 = vpop.eup %1402  ;;  %1336 = vmatpush3.msra.mxu0 %v608_v59  ;;  %v875_v59 = vld [vmem:[%s1718_s4] sm:$0xff] }
 0x2b9   :  { %599 = vadd.xlane.f32.xlu0 %v598_v60  ;;  %v454_v62 = vsel %vm306_vm6, %v1403_v61, 0.0 }
 0x2ba   :  { %455 = vadd.xlane.f32.xlu1 %v454_v62  ;;  %v749_v6 = vpop.permute.xlu1 %748 }
 0x2bc   :  { %v1405_v63 = vpop.eup %1404 }
 0x2bd   :  { %v1407_v0 = vpop.eup %1406  ;;  %v595_v1 = vsel %vm306_vm6, %v1405_v63, 0.0 }
 0x2be   :  { %596 = vadd.xlane.f32.xlu1 %v595_v1  ;;  %v739_v2 = vsel %vm306_vm6, %v1407_v0, 0.0 }
 0x2bf   :  { %740 = vadd.xlane.f32.xlu0 %v739_v2 }
 0x2c0   :  { %v1409_v3 = vpop.eup %1408 }
 0x2c1   :  { %v736_v4 = vsel %vm306_vm6, %v1409_v3, 0.0 }
 0x2c2   :  { %737 = vadd.xlane.f32.xlu1 %v736_v4 }
 0x2d3   :  { %746 = vrot.lane.b32.xlu1 %v1560_v14, %s1471_s28 }
 0x2d5   :  { %605 = vrot.lane.b32.xlu0 %v1560_v14, %s1470_s27 }
 0x339   :  { %v324_v7 = vpop.xlane.xlu0 %323 }
 0x33a   :  { %1410 = vrcp.f32 %v324_v7 }
 0x33d   :  { %v321_v8 = vpop.xlane.xlu1 %320 }
 0x33e   :  { %1412 = vrcp.f32 %v321_v8  ;;  %v459_v9 = vpop.xlane.xlu0 %458 }
 0x33f   :  { %1414 = vrcp.f32 %v459_v9 }
 0x342   :  { %v600_v12 = vpop.xlane.xlu0 %599 }
 0x343   :  { %v456_v11 = vpop.xlane.xlu1 %455 }
 0x344   :  { %1416 = vrcp.f32 %v456_v11 }
 0x345   :  { %1418 = vrcp.f32 %v600_v12 }
 0x347   :  { %v597_v15 = vpop.xlane.xlu1 %596  ;;  %v1411_v17 = vpop.eup %1410 }
 0x348   :  { %1420 = vrcp.f32 %v597_v15  ;;  %v741_v16 = vpop.xlane.xlu0 %740  ;;  %v328_v21 = vmul.f32 %v1411_v17, %v1395_v47 }
 0x349   :  { %1422 = vrcp.f32 %v741_v16 }
 0x34b   :  { %v1413_v18 = vpop.eup %1412  ;;  %v738_v19 = vpop.xlane.xlu1 %737 }
 0x34c   :  { %1424 = vrcp.f32 %v738_v19  ;;  %v606_v14 = vpop.permute.xlu0 %605  ;;  %v326_v20 = vmul.f32 %v1413_v18, %v1397_v53  ;;  %v1415_v22 = vpop.eup %1414  ;;  %v877_v53 = vld [vmem:[%s1718_s4 + $0x10] sm:$0xff] }
 0x34d   :  { %1337 = vmatprep.subr.mxu0 %v606_v14  ;;  %v463_v27 = vmul.f32 %v1415_v22, %v1399_v55  ;;  %v876_v55 = vld [vmem:[%s1718_s4 + $0x8] sm:$0xff]  ;;  %s1473_s4 = smov 8  }
 0x34e   :  { %1338 = vmatpush3.msra.mxu0 %v606_v14  ;;  %1325 = vmatprep.mubr.msk.f32.mxu1 %vm306_vm6, %v326_v20 }
 0x34f   :  { %1326 = vmatmul.mubr.msk.f32.vlgmr.msra.gmra.mxu1 %vm306_vm6, %v328_v21  ;;  %v747_v30 = vpop.permute.xlu1 %746  ;;  %1349 = vmatprep.subr.mxu0 %v878_v52 }
 0x350   :  { %1329 = vmatpush3.msra.mxu1 %v467_v54 }
 0x351   :  { %v1417_v24 = vpop.eup %1416  ;;  %1330 = vmatprep.subr.mxu1 %v465_v5 }
 0x352   :  { %1331 = vmatpush3.msra.mxu1 %v465_v5  ;;  %v461_v26 = vmul.f32 %v1417_v24, %v1403_v61  ;;  %v1419_v28 = vpop.eup %1418 }
 0x353   :  { %1342 = vmatprep.subr.mxu1 %v749_v6  ;;  %v604_v32 = vmul.f32 %v1419_v28, %v1629_v58 }
 0x354   :  { %1332 = vmatprep.mubr.msk.f32.mxu1 %vm306_vm6, %v461_v26 }
 0x355   :  { %v1421_v29 = vpop.eup %1420  ;;  %1333 = vmatmul.mubr.msk.f32.vlgmr.msra.gmra.mxu1 %vm306_vm6, %v463_v27 }
 0x356   :  { %1343 = vmatpush3.msra.mxu1 %v749_v6  ;;  %v602_v31 = vmul.f32 %v1421_v29, %v1405_v63  ;;  %v1423_v33 = vpop.eup %1422 }
 0x357   :  { %1344 = vmatprep.subr.mxu1 %v747_v30  ;;  %v745_v36 = vmul.f32 %v1423_v33, %v1407_v0 }
 0x358   :  { %1345 = vmatpush3.msra.mxu1 %v747_v30  ;;  %1339 = vmatprep.mubr.msk.f32.mxu0 %vm306_vm6, %v602_v31 }
 0x359   :  { %v1425_v34 = vpop.eup %1424  ;;  %1340 = vmatmul.mubr.msk.f32.vlgmr.msra.gmra.mxu0 %vm306_vm6, %v604_v32  ;;  %1360 = vmatprep.subr.mxu1 %v1462_v10 }
 0x35a   :  { %v743_v35 = vmul.f32 %v1425_v34, %v1409_v3  ;;  %1350 = vmatpush3.msra.mxu0 %v878_v52  ;;  %v1240_v34 = vld [vmem:[%s1719_s5] ss:$0 sm:$0xff] }
 0x35b   :  { %1351 = vmatprep.subr.mxu0 %v877_v53 }
 0x35c   :  { %1346 = vmatprep.mubr.msk.f32.mxu1 %vm306_vm6, %v743_v35  ;;  %1352 = vmatpush3.msra.mxu0 %v877_v53 }
 0x35d   :  { %1347 = vmatmul.mubr.msk.f32.vlgmr.msra.gmra.mxu1 %vm306_vm6, %v745_v36  ;;  %1353 = vmatprep.subr.mxu0 %v876_v55 }
 0x35e   :  { %1364 = vmatprep.mubr.msk.f32.mxu1 %vm1463_vm1, %v1462_v10  ;;  %1354 = vmatpush3.msra.mxu0 %v876_v55 }
 0x35f   :  { %1355 = vmatprep.subr.mxu0 %v875_v59 }
 0x360   :  { %1356 = vmatpush3.msra.mxu0 %v875_v59 }
 0x40f   :  { %v1653_v38 = vpop.f32.mrf.mxu1 }
 0x410   :  { %v414_v12 = vmul.f32 1.442695, %v1653_v38  ;;  %vm411_vm7 = vcmp.gt.f32.partialorder %v1653_v38, 0.0 }
 0x411   :  { %v1655_v39 = vpop.f32.mrf.mxu1 }
 0x412   :  { %v412_v11 = vmul.f32 1.442695, %v1655_v39  ;;  %vm410_vm4 = vcmp.gt.f32.partialorder %v1655_v39, 0.0 }
 0x415   :  { %v1334_v40 = vpop.f32.mrf.mxu1 }
 0x416   :  { %v555_v13 = vmul.f32 1.442695, %v1334_v40  ;;  %vm552_vm15 = vcmp.gt.f32.partialorder %v1334_v40, 0.0 }
 0x417   :  { %v542_v41 = vpop.f32.mrf.mxu1 }
 0x418   :  { %v553_v42 = vmul.f32 1.442695, %v542_v41  ;;  %1426 = vpow2.f32 %v555_v13  ;;  %vm551_vm1 = vcmp.gt.f32.partialorder %v542_v41, 0.0 }
 0x419   :  { %v1341_v43 = vpop.f32.mrf.mxu0 }
 0x41a   :  { %v696_v44 = vmul.f32 1.442695, %v1341_v43  ;;  %vm693_vm13 = vcmp.gt.f32.partialorder %v1341_v43, 0.0 }
 0x41b   :  { %v683_v45 = vpop.f32.mrf.mxu0 }
 0x41c   :  { %1428 = vpow2.f32 %v696_v44  ;;  %v694_v46 = vmul.f32 1.442695, %v683_v45  ;;  %vm692_vm14 = vcmp.gt.f32.partialorder %v683_v45, 0.0 }
 0x41d   :  { %1430 = vpow2.f32 %v553_v42  ;;  %v1348_v47 = vpop.f32.mrf.mxu1 }
 0x41e   :  { %1432 = vpow2.f32 %v694_v46  ;;  %v837_v48 = vmul.f32 1.442695, %v1348_v47  ;;  %vm834_vm2 = vcmp.gt.f32.partialorder %v1348_v47, 0.0 }
 0x41f   :  { %v824_v50 = vpop.f32.mrf.mxu1 }
 0x420   :  { %1434 = vpow2.f32 %v837_v48  ;;  %v835_v51 = vmul.f32 1.442695, %v824_v50  ;;  %vm833_vm3 = vcmp.gt.f32.partialorder %v824_v50, 0.0 }
 0x422   :  { %1436 = vpow2.f32 %v835_v51 }
 0x423   :  { %1438 = vpow2.f32 %v412_v11 }
 0x424   :  { %1440 = vpow2.f32 %v414_v12 }
 0x425   :  { %v1427_v54 = vpop.eup %1426 }
 0x426   :  { %v1229_v63 = vadd.f32 -1.0, %v1427_v54 }
 0x428   :  { %v560_v4 = vsel %vm552_vm15, %v1334_v40, %v1229_v63 }
 0x429   :  { %v1429_v56 = vpop.eup %1428 }
 0x42a   :  { %v1431_v57 = vpop.eup %1430  ;;  %v1233_v58 = vadd.f32 -1.0, %v1429_v56 }
 0x42b   :  { %v1433_v60 = vpop.eup %1432  ;;  %v1228_v2 = vadd.f32 -1.0, %v1431_v57 }
 0x42c   :  { %v701_v61 = vsel %vm693_vm13, %v1341_v43, %v1233_v58  ;;  %v1232_v62 = vadd.f32 -1.0, %v1433_v60 }
 0x42d   :  { %v1435_v0 = vpop.eup %1434  ;;  %855 = vrot.lane.b32.xlu1 %v701_v61, %s1472_s15  ;;  %v559_v6 = vsel %vm551_vm1, %v542_v41, %v1228_v2  ;;  %v976_v41 = vld [vmem:[%s1720_s6] sm:$0x1] }
 0x42e   :  { %v700_v1 = vsel %vm692_vm14, %v683_v45, %v1232_v62  ;;  %v1237_v5 = vadd.f32 -1.0, %v1435_v0 }
 0x42f   :  { %v1437_v3 = vpop.eup %1436  ;;  %853 = vrot.lane.b32.xlu0 %v700_v1, %s1472_s15 }
 0x430   :  { %v1236_v7 = vadd.f32 -1.0, %v1437_v3  ;;  %v842_v8 = vsel %vm834_vm2, %v1348_v47, %v1237_v5  ;;  %v1439_v15 = vpop.eup %1438 }
 0x431   :  { %847 = vrot.lane.b32.xlu1 %v560_v4, %s1473_s4  ;;  %v1441_v16 = vpop.eup %1440  ;;  %v1224_v18 = vadd.f32 -1.0, %v1439_v15 }
 0x432   :  { %v841_v9 = vsel %vm833_vm3, %v824_v50, %v1236_v7  ;;  %v1225_v14 = vadd.f32 -1.0, %v1441_v16 }
 0x433   :  { %845 = vrot.lane.b32.xlu0 %v559_v6, %s1473_s4  ;;  %v418_v21 = vsel %vm410_vm4, %v1655_v39, %v1224_v18 }
 0x434   :  { %v419_v24 = vsel %vm411_vm7, %v1653_v38, %v1225_v14 }
 0x435   :  { %863 = vrot.lane.b32.xlu1 %v842_v8, %s1474_s16 }
 0x437   :  { %861 = vrot.lane.b32.xlu0 %v841_v9, %s1474_s16 }
 0x49f   :  { %v856_v17 = vpop.permute.xlu1 %855 }
 0x4a1   :  { %v854_v19 = vpop.permute.xlu0 %853 }
 0x4a3   :  { %v848_v20 = vpop.permute.xlu1 %847 }
 0x4a4   :  { %v869_v27 = vsel %vm867_vm5, %v419_v24, %v848_v20 }
 0x4a5   :  { %v846_v22 = vpop.permute.xlu0 %845  ;;  %v871_v31 = vsel %vm306_vm6, %v869_v27, %v856_v17 }
 0x4a6   :  { %v868_v26 = vsel %vm867_vm5, %v418_v21, %v846_v22 }
 0x4a7   :  { %v864_v28 = vpop.permute.xlu1 %863  ;;  %v870_v29 = vsel %vm306_vm6, %v868_v26, %v854_v19 }
 0x4a8   :  { %v874_v33 = vsel %vm872_vm8, %v871_v31, %v864_v28 }
 0x4a9   :  { %v862_v30 = vpop.permute.xlu0 %861 }
 0x4aa   :  { %v873_v32 = vsel %vm872_vm8, %v870_v29, %v862_v30 }
 0x4ab   :  { %1357 = vmatprep.mubr.msk.f32.mxu0 %vm41_vm0, %v873_v32 }
 0x4ac   :  { %1358 = vmatmul.mubr.msk.f32.vlgmr.msra.gmra.mxu0 %vm41_vm0, %v874_v33 }
 0x56c   :  { %v1359_v35 = vpop.f32.mrf.mxu0 }
 0x56d   :  { %1361 = vmatpush3.xpose.msk.msra.mxu1 %vm969_vm9, %v1359_v35  ;;  %1367 = vmatprep.subr.mxu0 %v1359_v35  ;;  %v968_v36 = vmul.f32 %v1359_v35, %v1240_v34 }
 0x56e   :  { %v951_v38 = vpop.f32.mrf.mxu0  ;;  %1368 = vmatpush3.msra.mxu0 %v1359_v35  ;;  %1362 = vmatprep.subr.mxu1 %v1462_v10 }
 0x56f   :  { %1369 = vmatprep.subr.mxu0 %v951_v38  ;;  %v973_v39 = vsel %vm969_vm9, %v968_v36, 0.0  ;;  %v967_v40 = vmul.f32 %v1240_v34, %v951_v38 }
 0x570   :  { %974 = vadd.xlane.f32.xlu1 %v973_v39  ;;  %1370 = vmatpush3.msra.mxu0 %v951_v38 }
 0x571   :  { %1363 = vmatpush3.xpose.msk.msra.mxu1 %vm969_vm9, %v951_v38  ;;  %v970_v13 = vsel %vm969_vm9, %v967_v40, 0.0 }
 0x572   :  { %971 = vadd.xlane.f32.xlu0 %v970_v13 }
 0x574   :  { %1365 = vmatmul.mubr.msk.f32.vlgmr.msra.gmra.mxu1 %vm969_vm9, %v976_v41 }
 0x5f9   :  { %v975_v43 = vpop.xlane.xlu1 %974 }
 0x5fb   :  { %v972_v44 = vpop.xlane.xlu0 %971 }
 0x634   :  { %v1052_v42 = vpop.f32.mrf.mxu1 }
 0x635   :  { %v1059_v10 = vrot.slane %v1052_v42, %v294_v25 }
 0x636   :  { %v1366_v45 = vpop.f32.mrf.mxu1 }
 0x637   :  { %v1060_v46 = vadd.f32 %v1059_v10, %v972_v44  ;;  %v1061_v47 = vadd.f32 %v1059_v10, %v975_v43 }
 0x639   :  { %v1064_v48 = vmul.f32 0.2, %v1060_v46  ;;  %v1065_v50 = vmul.f32 0.2, %v1061_v47  ;;  %vm1062_vm0 = vcmp.gt.f32.partialorder %v1060_v46, 0.0  ;;  %vm1063_vm10 = vcmp.gt.f32.partialorder %v1061_v47, 0.0 }
 0x63b   :  { %v1066_v51 = vsel %vm1062_vm0, %v1060_v46, %v1064_v48  ;;  %v1067_v52 = vsel %vm1063_vm10, %v1061_v47, %v1065_v50 }
 0x63c   :  { %v1068_v53 = vadd.f32 %v1066_v51, %v1600_v49  ;;  %v1069_v55 = vadd.f32 %v1067_v52, %v1594_v37 }
 0x63e   :  { %v1070_v54 = vsel %vm306_vm6, %v1068_v53, -inf  ;;  %v1073_v23 = vsel %vm306_vm6, %v1069_v55, -inf }
 0x63f   :  { %1071 = vmax.xlane.f32.xlu0 %v1070_v54 }
 0x643   :  { %1074 = vmax.xlane.f32.xlu0 %v1073_v23 }
 0x6c8   :  { %v1072_v25 = vpop.xlane.xlu0 %1071 }
 0x6c9   :  { %v1076_v56 = vsub.f32 %v1068_v53, %v1072_v25 }
 0x6cb   :  { %v1078_v57 = vmul.f32 1.442695, %v1076_v56 }
 0x6cc   :  { %v1075_v58 = vpop.xlane.xlu0 %1074 }
 0x6cd   :  { %1442 = vpow2.f32 %v1078_v57  ;;  %v1077_v59 = vsub.f32 %v1069_v55, %v1075_v58 }
 0x6cf   :  { %v1080_v60 = vmul.f32 1.442695, %v1077_v59 }
 0x6d1   :  { %1444 = vpow2.f32 %v1080_v60 }
 0x6da   :  { %v1443_v61 = vpop.eup %1442 }
 0x6db   :  { %v1082_v62 = vsel %vm306_vm6, %v1443_v61, 0.0 }
 0x6dc   :  { %1083 = vadd.xlane.f32.xlu1 %v1082_v62 }
 0x6de   :  { %v1445_v49 = vpop.eup %1444 }
 0x6df   :  { %v1085_v63 = vsel %vm306_vm6, %v1445_v49, 0.0 }
 0x6e0   :  { %1086 = vadd.xlane.f32.xlu0 %v1085_v63 }
 0x765   :  { %v1084_v37 = vpop.xlane.xlu1 %1083 }
 0x766   :  { %1446 = vrcp.f32 %v1084_v37 }
 0x769   :  { %v1087_v0 = vpop.xlane.xlu0 %1086 }
 0x76a   :  { %1448 = vrcp.f32 %v1087_v0 }
 0x773   :  { %v1447_v1 = vpop.eup %1446 }
 0x774   :  { %v1089_v2 = vmul.f32 %v1447_v1, %v1443_v61 }
 0x776   :  { %1371 = vmatprep.mubr.msk.f32.mxu0 %vm306_vm6, %v1089_v2 }
 0x777   :  { %v1449_v3 = vpop.eup %1448 }
 0x778   :  { %v1091_v4 = vmul.f32 %v1449_v3, %v1445_v49 }
 0x77a   :  { %1372 = vmatmul.mubr.msk.f32.vlgmr.msra.gmra.mxu0 %vm306_vm6, %v1091_v4 }
 0x83a   :  { %v1373_v5 = vpop.f32.mrf.mxu0 }
 0x83b   :  { %v1177_v6 = vmul.f32 1.442695, %v1373_v5  ;;  %vm1174_vm11 = vcmp.gt.f32.partialorder %v1373_v5, 0.0 }
 0x83c   :  { %v1164_v7 = vpop.f32.mrf.mxu0 }
 0x83d   :  { %1450 = vpow2.f32 %v1177_v6  ;;  %v1175_v8 = vmul.f32 1.442695, %v1164_v7  ;;  %vm1173_vm12 = vcmp.gt.f32.partialorder %v1164_v7, 0.0 }
 0x83f   :  { %1452 = vpow2.f32 %v1175_v8 }
 0x84a   :  { %v1451_v9 = vpop.eup %1450 }
 0x84b   :  { %v1247_v11 = vadd.f32 -1.0, %v1451_v9 }
 0x84c   :  { %v1453_v12 = vpop.eup %1452 }
 0x84d   :  { %v1246_v15 = vadd.f32 -1.0, %v1453_v12  ;;  %v1182_v16 = vsel %vm1174_vm11, %v1373_v5, %v1247_v11 }
 0x84e   :  { %v1186_v17 = vsel %vm969_vm9, %v1182_v16, -inf }
 0x84f   :  { %v1181_v18 = vsel %vm1173_vm12, %v1164_v7, %v1246_v15  ;;  %1187 = vmax.xlane.f32.xlu0 %v1186_v17 }
 0x850   :  { %v1183_v19 = vsel %vm969_vm9, %v1181_v18, -inf }
 0x851   :  { %1184 = vmax.xlane.f32.xlu1 %v1183_v19 }
 0x8d8   :  { %v1188_v14 = vpop.xlane.xlu0 %1187 }
 0x8d9   :  { %v1190_v20 = vsub.f32 %v1182_v16, %v1188_v14 }
 0x8da   :  { %v1185_v21 = vpop.xlane.xlu1 %1184 }
 0x8db   :  { %v1193_v22 = vmul.f32 1.442695, %v1190_v20  ;;  %v1189_v24 = vsub.f32 %v1181_v18, %v1185_v21 }
 0x8dd   :  { %1454 = vpow2.f32 %v1193_v22  ;;  %v1191_v26 = vmul.f32 1.442695, %v1189_v24 }
 0x8df   :  { %1456 = vpow2.f32 %v1191_v26 }
 0x8ea   :  { %v1455_v27 = vpop.eup %1454 }
 0x8eb   :  { %v1198_v28 = vsel %vm969_vm9, %v1455_v27, 0.0 }
 0x8ec   :  { %v1457_v29 = vpop.eup %1456  ;;  %1199 = vadd.xlane.f32.xlu0 %v1198_v28 }
 0x8ed   :  { %v1195_v30 = vsel %vm969_vm9, %v1457_v29, 0.0 }
 0x8ee   :  { %1196 = vadd.xlane.f32.xlu1 %v1195_v30 }
 0x975   :  { %v1200_v31 = vpop.xlane.xlu0 %1199 }
 0x976   :  { %1458 = vlog2.f32 %v1200_v31 }
 0x977   :  { %v1197_v32 = vpop.xlane.xlu1 %1196 }
 0x978   :  { %1460 = vlog2.f32 %v1197_v32 }
 0x983   :  { %v1459_v33 = vpop.eup %1458 }
 0x984   :  { %v1204_v34 = vmul.f32 0.6931472, %v1459_v33 }
 0x985   :  { %v1461_v35 = vpop.eup %1460 }
 0x986   :  { %v1206_v36 = vadd.f32 %v1204_v34, %v1188_v14  ;;  %v1202_v38 = vmul.f32 0.6931472, %v1461_v35 }
 0x988   :  { %v1208_v39 = vsub.f32 %v1182_v16, %v1206_v36  ;;  %v1205_v40 = vadd.f32 %v1202_v38, %v1185_v21 }
 0x98a   :  { %1210 = vst.msk [vmem:[%s1721_s8 + $0x8] sm:$0xff] %vm969_vm9, %v1208_v39  ;;  %v1207_v13 = vsub.f32 %v1181_v18, %v1205_v40 }
 0x98c   :  { %1209 = vst.msk [vmem:[%s1721_s8] sm:$0xff] %vm969_vm9, %v1207_v13 }

</bundles_post_ra>
